<compile_context>
chip_gen: v7x
topology: tpu7x:2x2x1
jax: 0.10.0
libtpu: 0.0.40
codegen_flags: <defaults>
</compile_context>

<pallas_src>
import functools
import math

import jax
import jax.numpy as jnp
from jax.experimental import pallas as pl
from jax.experimental.pallas import tpu as pltpu


_LANE = 128
_SUBLANE = 8
_MAX_ROW_TILE = 512
# Weights bigger than this (per copy) use the (M, N, K)-tiled path instead of
# staying resident (resident constant-index blocks are double-buffered).
_RESIDENT_WEIGHT_BYTES = 8 * 1024 * 1024
_VMEM_CLAMP = 48 * 1024 * 1024        # below physical VMEM on v5e/v6e/v7x
_VMEM_FLOOR = 32 * 1024 * 1024
_VMEM_HEADROOM = 4 * 1024 * 1024


def _round_up(a, b):
    return (a + b - 1) // b * b


def _pick_nk_tile(dp, max_tile):
    """Largest of {512, 256, 128} that divides dp and is <= max_tile."""
    for cand in (512, 256, 128):
        if cand <= max_tile and dp % cand == 0:
            return cand
    return 128  # dp is always a multiple of 128


def _clamp_vmem(est_bytes):
    return int(min(max(est_bytes + _VMEM_HEADROOM, _VMEM_FLOOR), _VMEM_CLAMP))


# ---------------------------------------------------------------------------
# Kernels
# ---------------------------------------------------------------------------
def _inv_linear_resident_kernel(x_ref, wT_ref, b_ref, o_ref):
    # x_ref : (tm, Dp)  activation tile (storage dtype, fed straight to MXU)
    # wT_ref: (Dp, Dp)  Winv^T, resident across the whole row grid
    # b_ref : (1, Dp)   folded bias (f32)
    # o_ref : (tm, Dp)
    acc = jnp.dot(x_ref[...], wT_ref[...], preferred_element_type=jnp.float32)
    o_ref[...] = (acc + b_ref[...]).astype(o_ref.dtype)


def _inv_linear_tiled_kernel(x_ref, wT_ref, b_ref, o_ref, acc_ref):
    # x_ref : (tm, tk),  wT_ref: (tk, tn),  b_ref: (1, tn) f32,
    # o_ref : (tm, tn),  acc_ref: (tm, tn) f32 scratch
    k = pl.program_id(2)

    @pl.when(k == 0)
    def _():
        acc_ref[...] = jnp.zeros_like(acc_ref)

    acc_ref[...] += jnp.dot(x_ref[...], wT_ref[...],
                            preferred_element_type=jnp.float32)

    @pl.when(k == pl.num_programs(2) - 1)
    def _():
        o_ref[...] = (acc_ref[...] + b_ref[...]).astype(o_ref.dtype)


# ---------------------------------------------------------------------------
# Forward (jitted; parameters are pre-prepared by InverseLinearPallas)
# ---------------------------------------------------------------------------
@functools.partial(
    jax.jit,
    static_argnames=("d_orig", "n_heads", "force_tiled", "max_nk_tile"))
def _inverse_linear_apply(x, wT_pad, b_pad, *, d_orig, n_heads,
                          force_tiled, max_nk_tile):
    *lead, D = x.shape
    assert D == d_orig, (D, d_orig)
    Dp = wT_pad.shape[0]

    M = math.prod(lead) if lead else 1
    x2d = x.reshape(M, D)

    # Pad rows to a sublane multiple and lanes to the padded feature dim.
    Mp = _round_up(max(M, 1), _SUBLANE)
    if Mp != M or Dp != D:
        x2d = jnp.pad(x2d, ((0, Mp - M), (0, Dp - D)))

    out_dtype = x.dtype
    tm = min(_MAX_ROW_TILE, Mp)
    grid_m = pl.cdiv(Mp, tm)

    w_bytes = Dp * Dp * wT_pad.dtype.itemsize
    use_tiled = force_tiled or (w_bytes > _RESIDENT_WEIGHT_BYTES)

    if not use_tiled:
        # Whole weight resident in VMEM, 1-D row-parallel grid.
        est = (2 * w_bytes
               + 2 * b_pad.size * b_pad.dtype.itemsize
               + 2 * tm * Dp * x.dtype.itemsize
               + 2 * tm * Dp * jnp.dtype(out_dtype).itemsize)
        out2d = pl.pallas_call(
            _inv_linear_resident_kernel,
            out_shape=jax.ShapeDtypeStruct((Mp, Dp), out_dtype),
            grid_spec=pltpu.PrefetchScalarGridSpec(
                num_scalar_prefetch=0,
                grid=(grid_m,),
                in_specs=[
                    pl.BlockSpec((tm, Dp), lambda i: (i, 0)),   # x tile
                    pl.BlockSpec((Dp, Dp), lambda i: (0, 0)),   # Winv^T resident
                    pl.BlockSpec((1, Dp), lambda i: (0, 0)),    # folded bias
                ],
                out_specs=pl.BlockSpec((tm, Dp), lambda i: (i, 0)),
            ),
            compiler_params=pltpu.CompilerParams(
                dimension_semantics=("parallel",),
                vmem_limit_bytes=_clamp_vmem(est)),
        )(x2d, wT_pad, b_pad)
    else:
        # (M, N, K)-tiled grid with f32 accumulator — fits v7x's 64 MiB VMEM.
        tn = _pick_nk_tile(Dp, max_nk_tile)
        tk = _pick_nk_tile(Dp, max_nk_tile)
        grid = (grid_m, Dp // tn, Dp // tk)
        est = (2 * tm * tk * x.dtype.itemsize
               + 2 * tk * tn * wT_pad.dtype.itemsize
               + 2 * tn * b_pad.dtype.itemsize
               + 2 * tm * tn * jnp.dtype(out_dtype).itemsize
               + tm * tn * 4)
        out2d = pl.pallas_call(
            _inv_linear_tiled_kernel,
            out_shape=jax.ShapeDtypeStruct((Mp, Dp), out_dtype),
            grid_spec=pltpu.PrefetchScalarGridSpec(
                num_scalar_prefetch=0,
                grid=grid,
                in_specs=[
                    pl.BlockSpec((tm, tk), lambda i, j, k: (i, k)),  # x
                    pl.BlockSpec((tk, tn), lambda i, j, k: (k, j)),  # Winv^T
                    pl.BlockSpec((1, tn), lambda i, j, k: (0, j)),   # bias
                ],
                out_specs=pl.BlockSpec((tm, tn), lambda i, j, k: (i, j)),
                scratch_shapes=[pltpu.VMEM((tm, tn), jnp.float32)],
            ),
            compiler_params=pltpu.CompilerParams(
                dimension_semantics=("parallel", "parallel", "arbitrary"),
                vmem_limit_bytes=_clamp_vmem(est)),
        )(x2d, wT_pad, b_pad)

    out2d = out2d[:M, :D]
    return out2d.reshape(*lead, n_heads, D // n_heads)


# ---------------------------------------------------------------------------
# Module-like wrapper: parameter prep happens once (inverse, transpose,
# bias folding, lane padding), forward only runs the Pallas kernel.
# ---------------------------------------------------------------------------
class InverseLinearPallas:
    def __init__(self, original_weights, original_biases=None, n_heads=1,
                 weight_dtype=None, force_tiled=False, max_nk_tile=512):
        W = jnp.asarray(original_weights)
        if W.ndim != 2 or W.shape[0] != W.shape[1]:
            raise ValueError("Original Linear layer must be square")
        D = W.shape[0]
        if D % n_heads != 0:
            raise ValueError("n_heads must divide the feature dimension")
        if original_biases is None:
            bias = jnp.zeros((D,), dtype=W.dtype)
        else:
            bias = jnp.asarray(original_biases)

        # TODO(synk): torch does the inversion in float64; TPU defaults to
        # float32, so the inversion here is done in float32.
        W_inv = jnp.linalg.inv(W.astype(jnp.float32)).astype(W.dtype)
        inverse_bias = -bias

        # Fold the bias through the inverse:
        #   (x + b) @ Winv^T = x @ Winv^T + (Winv @ b)
        b_fold = jnp.dot(W_inv.astype(jnp.float32),
                         inverse_bias.astype(jnp.float32))

        Dp = _round_up(D, _LANE)
        wT = jnp.pad(W_inv.T, ((0, Dp - D), (0, Dp - D)))  # transposed ONCE here
        if weight_dtype is not None:
            wT = wT.astype(weight_dtype)   # e.g. bf16 for full-rate MXU
        b_fold = jnp.pad(b_fold, (0, Dp - D)).reshape(1, Dp).astype(jnp.float32)

        self.inverse_weights = W_inv
        self.inverse_bias = inverse_bias
        self.n_heads = n_heads
        self.d = D
        self._wT = wT
        self._b = b_fold
        self._force_tiled = bool(force_tiled)
        self._max_nk_tile = int(max_nk_tile)

    def __call__(self, x):
        return _inverse_linear_apply(
            x, self._wT, self._b,
            d_orig=self.d, n_heads=self.n_heads,
            force_tiled=self._force_tiled, max_nk_tile=self._max_nk_tile)


def _reference_forward(x, inverse_weights, inverse_bias, n_heads):
    y = (x + inverse_bias) @ inverse_weights.T
    return y.reshape(*x.shape[:-1], n_heads, y.shape[-1] // n_heads)


if __name__ == "__main__":
    key = jax.random.PRNGKey(0)
    k_w, k_b, k_x, k_w2, k_b2, k_x2 = jax.random.split(key, 6)

    # --- test 1: small D (exercises lane padding + resident-weight path) ----
    batch, seq, D, n_heads = 2, 8, 32, 4
    W = (jax.random.normal(k_w, (D, D), dtype=jnp.float32)
         + D * jnp.eye(D, dtype=jnp.float32))          # comfortably invertible
    b = jax.random.normal(k_b, (D,), dtype=jnp.float32)
    x = jax.random.normal(k_x, (batch, seq, D), dtype=jnp.float32)

    layer = InverseLinearPallas(W, b, n_heads=n_heads)
    out = jax.block_until_ready(layer(x))
    ref = _reference_forward(x, layer.inverse_weights, layer.inverse_bias, n_heads)
    assert out.shape == (batch, seq, n_heads, D // n_heads), out.shape
    assert jnp.allclose(out, ref, atol=1e-4, rtol=1e-4), "resident path mismatch"

    # --- test 2: 128-multiple D, forced (M, N, K)-tiled path with K accum ---
    batch2, seq2, D2, n_heads2 = 2, 8, 256, 2
    W2 = (jax.random.normal(k_w2, (D2, D2), dtype=jnp.float32)
          + D2 * jnp.eye(D2, dtype=jnp.float32))
    b2 = jax.random.normal(k_b2, (D2,), dtype=jnp.float32)
    x2 = jax.random.normal(k_x2, (batch2, seq2, D2), dtype=jnp.float32)

    layer2 = InverseLinearPallas(W2, b2, n_heads=n_heads2,
                                 force_tiled=True, max_nk_tile=128)
    out2 = jax.block_until_ready(layer2(x2))
    ref2 = _reference_forward(x2, layer2.inverse_weights, layer2.inverse_bias,
                              n_heads2)
    assert out2.shape == (batch2, seq2, n_heads2, D2 // n_heads2), out2.shape
    assert jnp.allclose(out2, ref2, atol=1e-4, rtol=1e-4), "tiled path mismatch"

    print("KERNEL_OK")
</pallas_src>

<mosaic_0001>
module attributes {stable_mosaic.version = 11 : i64} {
  func.func @_inv_linear_resident_kernel(%arg0: i32, %arg1: memref<16x128xf32, #tpu.memory_space<vmem>>, %arg2: memref<128x128xf32, #tpu.memory_space<vmem>>, %arg3: memref<1x128xf32, #tpu.memory_space<vmem>>, %arg4: memref<16x128xf32, #tpu.memory_space<vmem>>) attributes {dimension_semantics = [#tpu.dimension_semantics<parallel>], iteration_bounds = array<i64: 1>, scalar_prefetch = 0 : i64, scratch_operands = 0 : i64, tpu.core_type = #tpu.core_type<tc>, window_params = [{transform_indices = @transform_0, window_bounds = array<i64: 16, 128>}, {pipeline_mode = #tpu.pipeline_mode<synchronous>, transform_indices = @transform_1, window_bounds = array<i64: 128, 128>}, {pipeline_mode = #tpu.pipeline_mode<synchronous>, transform_indices = @transform_2, window_bounds = array<i64: 1, 128>}, {transform_indices = @transform_3, window_bounds = array<i64: 16, 128>}]} {
    %c0 = arith.constant 0 : index
    %c0_0 = arith.constant 0 : index
    %0 = vector.load %arg1[%c0, %c0_0] : memref<16x128xf32, #tpu.memory_space<vmem>>, vector<16x128xf32>
    %c0_1 = arith.constant 0 : index
    %c0_2 = arith.constant 0 : index
    %1 = vector.load %arg2[%c0_1, %c0_2] : memref<128x128xf32, #tpu.memory_space<vmem>>, vector<128x128xf32>
    %cst = arith.constant dense<0.000000e+00> : vector<16x128xf32>
    %2 = tpu.matmul %0, %1, %cst {dimension_numbers = #tpu.dot_dimension_numbers<[1], [0], [0], [1], [0, 0, 1, 1], [], []>} : vector<16x128xf32>, vector<128x128xf32>, vector<16x128xf32> -> vector<16x128xf32>
    %c0_3 = arith.constant 0 : index
    %c0_4 = arith.constant 0 : index
    %3 = vector.load %arg3[%c0_3, %c0_4] : memref<1x128xf32, #tpu.memory_space<vmem>>, vector<1x128xf32>
    %4 = vector.broadcast %3 : vector<1x128xf32> to vector<16x128xf32>
    %5 = arith.addf %2, %4 : vector<16x128xf32>
    %c0_5 = arith.constant 0 : index
    %c0_6 = arith.constant 0 : index
    %6 = vector.load %arg4[%c0_5, %c0_6] : memref<16x128xf32, #tpu.memory_space<vmem>>, vector<16x128xf32>
    tpu.vector_store %arg4[%c0_5, %c0_6], %5 {strides = array<i32>} : memref<16x128xf32, #tpu.memory_space<vmem>>, vector<16x128xf32>,
    return
  }
  func.func @transform_0(%arg0: i32) -> (i32, i32) {
    %c0_i32 = arith.constant 0 : i32
    %c0_i32_0 = arith.constant 0 : i32
    return %arg0, %c0_i32 : i32, i32
  }
  func.func @transform_1(%arg0: i32) -> (i32, i32) {
    %c0_i32 = arith.constant 0 : i32
    %c0_i32_0 = arith.constant 0 : i32
    %c0_i32_1 = arith.constant 0 : i32
    return %c0_i32, %c0_i32_0 : i32, i32
  }
  func.func @transform_2(%arg0: i32) -> (i32, i32) {
    %c0_i32 = arith.constant 0 : i32
    %c0_i32_0 = arith.constant 0 : i32
    %c0_i32_1 = arith.constant 0 : i32
    return %c0_i32, %c0_i32_0 : i32, i32
  }
  func.func @transform_3(%arg0: i32) -> (i32, i32) {
    %c0_i32 = arith.constant 0 : i32
    %c0_i32_0 = arith.constant 0 : i32
    return %arg0, %c0_i32 : i32, i32
  }
}

</mosaic_0001>

<bundles_post_ra>
// kernel: _inverse_linear_apply.1
= control target key start
LH: loop header
LB: loop body
LE: loop exit
PB: predicated region body
PF: predicated region fallthrough
CT: control target
= control target key end

     0   :  { %8 = vsyncpa [#allocation3], 0  ;;  %s248_s12 = smov [#allocation2]   ;;  %s298_s0 = inlined_call_operand.vmem [shape: f32[16,128], index: 0, kind: input, shape index: {}]   ;;  %s299_s1 = inlined_call_operand.hbm [shape: f32[128,128], index: 1, kind: input, shape index: {}]   ;;  %s300_s2 = inlined_call_operand.vmem [shape: f32[1,128], index: 2, kind: input, shape index: {}]   ;;  %s301_s3 = inlined_call_operand.vmem [shape: f32[16,128], index: 3, kind: output, shape index: {}]  }
   0x1   :  { %s16_s13 = sshll.u32 %s248_s12, 4  ;;  %s224_s16 = scalar_lea.hbm %s299_s1, 2048  ;;  %s17_s13 = int_to_ptr.vmem [resolvable:$true] %s16_s13 }
   0x2   :  { %p225_p0 = scmp.ne.s32.totalorder %s299_s1, %s224_s16  ;;  %p228_p1 = scmp.lt.u32.totalorder %s224_s16, %s299_s1 }
   0x4   :  { %p230_p2 = pnand %p228_p1, %p225_p0 }
   0x6   :  { %233 = shalt.err (!%p230_p2)
}
   0x7   :  { %s234_s21 = scalar_lea.vmem %s17_s13, 2048  ;;  %p239_p4 = scmp.lt.s32.totalorder %s17_s13, %s17_s13 }
   0x8   :  { %p235_p3 = scmp.ne.s32.totalorder %s17_s13, %s234_s21  ;;  %p240_p5 = scmp.lt.s32.totalorder %s234_s21, %s234_s21 }
   0xa   :  { %p241_p6 = por %p240_p5, %p239_p4 }
   0xc   :  { %p242_p7 = pnand %p241_p6, %p235_p3 }
   0xe   :  { %245 = shalt.err (!%p242_p7)
}
   0xf   :  { %s249_s22 = smov 128   ;;  %s250_s23 = smov 8  }
  0x10   :  { %22 = dma.hbm_to_vmem [thread:$0]  %s299_s1, 2048, %s17_s13, [#allocation3], %s249_s22, %s249_s22, %s250_s23  }
  0x11   :  { %246 = dma.done.wait [#allocation3], 2048  }
  0x12   :  { %247 = vsyncadd [#allocation3], 4294965248  ;;  %v30_v0 = vld [vmem:[#allocation2] sm:$0xff]  ;;  %v31_v1 = vld [vmem:[#allocation2 + $0x8] sm:$0xff] }
  0x13   :  { %v32_v2 = vld [vmem:[#allocation2 + $0x10] sm:$0xff]  ;;  %v189_v3 = vpack.c.bf16 %v31_v1, %v30_v0  ;;  %v33_v4 = vld [vmem:[#allocation2 + $0x18] sm:$0xff]  ;;  %v34_v6 = vld [vmem:[#allocation2 + $0x20] sm:$0xff] }
  0x14   :  { %v193_v5 = vpack.c.bf16 %v33_v4, %v32_v2  ;;  %v35_v7 = vld [vmem:[#allocation2 + $0x28] sm:$0xff]  ;;  %v28_v9 = vld [vmem:[%s298_s0] sm:$0xff]  ;;  %v36_v10 = vld [vmem:[#allocation2 + $0x30] sm:$0xff] }
  0x15   :  { %190 = vmatprep.subr.bf16.mxu0 %v189_v3  ;;  %v197_v8 = vpack.c.bf16 %v35_v7, %v34_v6  ;;  %v37_v11 = vld [vmem:[#allocation2 + $0x38] sm:$0xff]  ;;  %186 = vmatprep.mubr.f32.mxu0 %v28_v9  ;;  %v38_v13 = vld [vmem:[#allocation2 + $0x40] sm:$0xff]  ;;  %v39_v14 = vld [vmem:[#allocation2 + $0x48] sm:$0xff] }
  0x16   :  { %192 = vmatpush3.bf16.msra.mxu0 %v189_v3  ;;  %v201_v12 = vpack.c.bf16 %v37_v11, %v36_v10  ;;  %v205_v15 = vpack.c.bf16 %v39_v14, %v38_v13  ;;  %v40_v16 = vld [vmem:[#allocation2 + $0x50] sm:$0xff]  ;;  %v41_v17 = vld [vmem:[#allocation2 + $0x58] sm:$0xff]  ;;  %v42_v19 = vld [vmem:[#allocation2 + $0x60] sm:$0xff] }
  0x17   :  { %194 = vmatprep.subr.bf16.mxu0 %v193_v5  ;;  %v209_v18 = vpack.c.bf16 %v41_v17, %v40_v16  ;;  %v43_v20 = vld [vmem:[#allocation2 + $0x68] sm:$0xff]  ;;  %v44_v22 = vld [vmem:[#allocation2 + $0x70] sm:$0xff]  ;;  %v45_v23 = vld [vmem:[#allocation2 + $0x78] sm:$0xff] }
  0x18   :  { %v213_v21 = vpack.c.bf16 %v43_v20, %v42_v19  ;;  %v217_v24 = vpack.c.bf16 %v45_v23, %v44_v22  ;;  %v29_v25 = vld [vmem:[%s298_s0 + $0x8] sm:$0xff]  ;;  %v135_v26 = vld [vmem:[%s300_s2] ss:$0 sm:$0xff] }
  0x1a   :  { %196 = vmatpush3.bf16.msra.mxu0 %v193_v5 }
  0x1b   :  { %198 = vmatprep.subr.bf16.mxu0 %v197_v8 }
  0x1e   :  { %200 = vmatpush3.bf16.msra.mxu0 %v197_v8 }
  0x1f   :  { %202 = vmatprep.subr.bf16.mxu0 %v201_v12 }
  0x22   :  { %204 = vmatpush3.bf16.msra.mxu0 %v201_v12 }
  0x23   :  { %206 = vmatprep.subr.bf16.mxu0 %v205_v15 }
  0x26   :  { %208 = vmatpush3.bf16.msra.mxu0 %v205_v15 }
  0x27   :  { %210 = vmatprep.subr.bf16.mxu0 %v209_v18 }
  0x2a   :  { %212 = vmatpush3.bf16.msra.mxu0 %v209_v18 }
  0x2b   :  { %214 = vmatprep.subr.bf16.mxu0 %v213_v21 }
  0x2e   :  { %216 = vmatpush3.bf16.msra.mxu0 %v213_v21 }
  0x2f   :  { %218 = vmatprep.subr.bf16.mxu0 %v217_v24 }
  0x32   :  { %220 = vmatpush3.bf16.msra.mxu0 %v217_v24 }
  0x35   :  { %187 = vmatmul.mubr.f32.vlgmr.msra.gmra.mrb[0].mxu0 %v29_v25 }
 0x108   :  { %v188_v27 = vpop.f32.mrb[0].mxu0 }
 0x109   :  { %v125_v28 = vadd.f32 %v188_v27, %v135_v26  ;;  %v119_v29 = vpop.f32.mrb[1].mxu0 }
 0x10a   :  { %v120_v30 = vadd.f32 %v135_v26, %v119_v29 }
 0x10b   :  { %129 = vst [vmem:[%s301_s3 + $0x8] sm:$0xff] %v125_v28 }
 0x10c   :  { %128 = vst [vmem:[%s301_s3] sm:$0xff] %v120_v30 }
 0x10d   :  { %134 = vsyncpa [#allocation3], 1 }

</bundles_post_ra>
